<compile_context>
chip_gen: v7x
topology: tpu7x:2x2x1
jax: 0.10.0
libtpu: 0.0.40
codegen_flags: <defaults>
</compile_context>

<pallas_src>
import functools

import jax
import jax.numpy as jnp
from jax.experimental import pallas as pl
from jax.experimental.pallas import tpu as pltpu


def _round_up(x, m):
    return (x + m - 1) // m * m


def _vmem_capacity_bytes():
    """Best-effort physical VMEM size; conservative fallback (v7x per-TC)."""
    try:
        info = pltpu.get_tpu_info()
        cap = getattr(info, "vmem_capacity_bytes", None)
        if cap:
            return int(cap)
    except Exception:
        pass
    return 64 * 1024 * 1024


def _classifier_kernel(x_ref, w1_ref, b1_ref, w2_ref, b2_ref, w3_ref, b3_ref,
                       *rest, inv_hw, return_ftrs):
    if return_ftrs:
        (o_ref,) = rest
    else:
        w4_ref, b4_ref, o_ref = rest

    # Global average pool over the spatial (lane) axis; accumulate in f32,
    # cast to bf16 only for the MXU operand.
    pooled = jnp.sum(x_ref[...].astype(jnp.float32), axis=-1) * inv_hw
    pooled = pooled.astype(jnp.bfloat16)

    # fc1 + ReLU (bf16 MXU matmul, f32 accumulate / bias / ReLU)
    h = jnp.dot(pooled, w1_ref[...], preferred_element_type=jnp.float32)
    h = jnp.maximum(h + b1_ref[...], 0.0)

    # fc2 + ReLU
    h = jnp.dot(h.astype(jnp.bfloat16), w2_ref[...],
                preferred_element_type=jnp.float32)
    h = jnp.maximum(h + b2_ref[...], 0.0)

    # ftrs + ReLU
    h = jnp.dot(h.astype(jnp.bfloat16), w3_ref[...],
                preferred_element_type=jnp.float32)
    h = jnp.maximum(h + b3_ref[...], 0.0)

    if return_ftrs:
        o_ref[...] = h.astype(o_ref.dtype)
    else:
        # fc_end (no ReLU)
        y = jnp.dot(h.astype(jnp.bfloat16), w4_ref[...],
                    preferred_element_type=jnp.float32)
        o_ref[...] = (y + b4_ref[...]).astype(o_ref.dtype)


def prepare_classifier_params(w1, b1, w2, b2, w3, b3, w4, b4):
    """One-time prep: pad output feature dims to 128 lanes, cast weights to bf16.

    Weights are (in, out); biases (out,).  The fc1 K dim (inplanes) is NOT
    padded (no compute/bandwidth benefit).  Call this once and reuse the
    result across forward calls.
    """
    D1, D2, Dh, Dc = w1.shape[1], w2.shape[1], w3.shape[1], w4.shape[1]
    D1p, D2p, Dhp, Dcp = (_round_up(d, 128) for d in (D1, D2, Dh, Dc))
    f32 = jnp.float32
    return dict(
        w1=jnp.pad(w1, ((0, 0), (0, D1p - D1))).astype(jnp.bfloat16),
        b1=jnp.pad(b1, (0, D1p - D1)).astype(f32).reshape(1, D1p),
        w2=jnp.pad(w2, ((0, D1p - D1), (0, D2p - D2))).astype(jnp.bfloat16),
        b2=jnp.pad(b2, (0, D2p - D2)).astype(f32).reshape(1, D2p),
        w3=jnp.pad(w3, ((0, D2p - D2), (0, Dhp - Dh))).astype(jnp.bfloat16),
        b3=jnp.pad(b3, (0, Dhp - Dh)).astype(f32).reshape(1, Dhp),
        w4=jnp.pad(w4, ((0, Dhp - Dh), (0, Dcp - Dc))).astype(jnp.bfloat16),
        b4=jnp.pad(b4, (0, Dcp - Dc)).astype(f32).reshape(1, Dcp),
        dims=(D1, D2, Dh, Dc),
    )


def classifier_ftrs_forward(x, params, ftrs=False):
    """x: (N, Cin, H, W), f32 or bf16.  params: output of prepare_classifier_params."""
    N, Cin, H, W = x.shape
    HW = H * W
    D1, D2, Dh, Dc = params["dims"]
    D1p = params["w1"].shape[1]
    D2p = params["w2"].shape[1]
    Dhp = params["w3"].shape[1]
    Dcp = params["w4"].shape[1]
    out_p, out_d = (Dhp, Dh) if ftrs else (Dcp, Dc)
    n_w4 = 0 if ftrs else 1

    # Free metadata reshape only — no padding, no dtype conversion pass.
    xr = x.reshape(N, Cin, HW)
    xbytes = jnp.dtype(x.dtype).itemsize

    # ---- generation-aware VMEM budget & batch-tile selection ----
    vmem_cap = _vmem_capacity_bytes()
    vmem_limit = min(100 * 1024 * 1024, (vmem_cap * 3) // 4)   # ~96 MiB v5e/v6e, ~48 MiB v7x
    budget = vmem_limit - 4 * 1024 * 1024                      # scheduling headroom

    # Resident weights/biases (x2: pipeline buffers).
    fixed = 2 * 2 * (Cin * D1p + D1p * D2p + D2p * Dhp + n_w4 * Dhp * Dcp)
    fixed += 2 * 4 * (D1p + D2p + Dhp + n_w4 * Dcp)
    # Per batch-row: double-buffered x tile + double-buffered out tile
    # + in-kernel intermediates (f32 accumulator + bf16 MXU copy ~ 6 B/elem).
    per_row = 2 * Cin * HW * xbytes + 2 * out_p * 4
    per_row += 6 * (Cin + D1p + D2p + Dhp + n_w4 * Dcp)

    avail = budget - fixed
    tn_fit = max(8, int(avail // per_row) // 8 * 8) if avail > per_row else 8
    TN = min(tn_fit, _round_up(N, 8))
    if N >= 16:
        # keep >= 2 grid tiles so v7x's two TensorCores both get work
        TN = min(TN, _round_up(-(-N // 2), 8))
    TN = max(TN, 8)

    # Pathological safety: never ask Mosaic for less VMEM than one step needs.
    min_need = fixed + TN * per_row + (2 << 20)
    if min_need > vmem_limit:
        vmem_limit = min(vmem_cap, min_need)

    grid = (pl.cdiv(N, TN),)

    in_specs = [
        pl.BlockSpec((TN, Cin, HW), lambda i: (i, 0, 0)),   # x tile (ragged edge masked)
        pl.BlockSpec((Cin, D1p), lambda i: (0, 0)),         # w1 (resident)
        pl.BlockSpec((1, D1p), lambda i: (0, 0)),           # b1
        pl.BlockSpec((D1p, D2p), lambda i: (0, 0)),         # w2
        pl.BlockSpec((1, D2p), lambda i: (0, 0)),           # b2
        pl.BlockSpec((D2p, Dhp), lambda i: (0, 0)),         # w3
        pl.BlockSpec((1, Dhp), lambda i: (0, 0)),           # b3
    ]
    args = [xr, params["w1"], params["b1"], params["w2"], params["b2"],
            params["w3"], params["b3"]]
    if not ftrs:
        in_specs += [pl.BlockSpec((Dhp, Dcp), lambda i: (0, 0)),   # w4
                     pl.BlockSpec((1, Dcp), lambda i: (0, 0))]     # b4
        args += [params["w4"], params["b4"]]

    kernel = functools.partial(_classifier_kernel,
                               inv_hw=1.0 / float(HW),
                               return_ftrs=bool(ftrs))

    out = pl.pallas_call(
        kernel,
        out_shape=jax.ShapeDtypeStruct((N, out_p), jnp.float32),
        grid=grid,
        in_specs=in_specs,
        out_specs=pl.BlockSpec((TN, out_p), lambda i: (i, 0)),
        compiler_params=pltpu.CompilerParams(
            dimension_semantics=("parallel",),   # batch tiles shard across v7x's 2 TCs
            vmem_limit_bytes=int(vmem_limit)),
    )(*args)

    return out[:, :out_d]


def _reference_forward(x, w1, b1, w2, b2, w3, b3, w4, b4, ftrs=False):
    pooled = jnp.mean(x.astype(jnp.float32), axis=(2, 3))
    h = jnp.maximum(pooled @ w1 + b1, 0.0)
    h = jnp.maximum(h @ w2 + b2, 0.0)
    h = jnp.maximum(h @ w3 + b3, 0.0)
    if ftrs:
        return h
    return h @ w4 + b4


if __name__ == "__main__":
    # Small deterministic setup consistent with the module (inplanes=32).
    N, Cin, H, W = 2, 32, 16, 16
    h_dim, num_classes = 16, 10

    key = jax.random.PRNGKey(0)
    ks = jax.random.split(key, 9)
    x = jax.random.normal(ks[0], (N, Cin, H, W), jnp.float32)
    w1 = jax.random.normal(ks[1], (Cin, 512), jnp.float32) * 0.1
    b1 = jax.random.normal(ks[2], (512,), jnp.float32) * 0.1
    w2 = jax.random.normal(ks[3], (512, 256), jnp.float32) * 0.05
    b2 = jax.random.normal(ks[4], (256,), jnp.float32) * 0.1
    w3 = jax.random.normal(ks[5], (256, h_dim), jnp.float32) * 0.05
    b3 = jax.random.normal(ks[6], (h_dim,), jnp.float32) * 0.1
    w4 = jax.random.normal(ks[7], (h_dim, num_classes), jnp.float32) * 0.1
    b4 = jax.random.normal(ks[8], (num_classes,), jnp.float32) * 0.1

    # One-time weight prep (padding + bf16 cast), reused across calls.
    params = prepare_classifier_params(w1, b1, w2, b2, w3, b3, w4, b4)

    y = jax.block_until_ready(classifier_ftrs_forward(x, params, ftrs=False))
    f = jax.block_until_ready(classifier_ftrs_forward(x, params, ftrs=True))

    y_ref = _reference_forward(x, w1, b1, w2, b2, w3, b3, w4, b4, ftrs=False)
    f_ref = _reference_forward(x, w1, b1, w2, b2, w3, b3, w4, b4, ftrs=True)

    assert y.shape == (N, num_classes), y.shape
    assert f.shape == (N, h_dim), f.shape
    # bf16 MXU operands -> looser tolerance vs. the f32 reference
    assert jnp.allclose(y, y_ref, atol=2e-2, rtol=2e-2)
    assert jnp.allclose(f, f_ref, atol=2e-2, rtol=2e-2)

    # Also exercise the low-bandwidth path: bf16 activations from the producer.
    yb = jax.block_until_ready(
        classifier_ftrs_forward(x.astype(jnp.bfloat16), params, ftrs=False))
    assert jnp.allclose(yb, y_ref, atol=5e-2, rtol=5e-2)

    print("KERNEL_OK")
</pallas_src>

<mosaic_0001>
module attributes {stable_mosaic.version = 11 : i64} {
  func.func @_classifier_kernel(%arg0: i32, %arg1: memref<8x32x256xf32, #tpu.memory_space<vmem>>, %arg2: memref<32x512xbf16, #tpu.memory_space<vmem>>, %arg3: memref<1x512xf32, #tpu.memory_space<vmem>>, %arg4: memref<512x256xbf16, #tpu.memory_space<vmem>>, %arg5: memref<1x256xf32, #tpu.memory_space<vmem>>, %arg6: memref<256x128xbf16, #tpu.memory_space<vmem>>, %arg7: memref<1x128xf32, #tpu.memory_space<vmem>>, %arg8: memref<128x128xbf16, #tpu.memory_space<vmem>>, %arg9: memref<1x128xf32, #tpu.memory_space<vmem>>, %arg10: memref<8x128xf32, #tpu.memory_space<vmem>>) attributes {dimension_semantics = [#tpu.dimension_semantics<parallel>], iteration_bounds = array<i64: 1>, scalar_prefetch = 0 : i64, scratch_operands = 0 : i64, tpu.core_type = #tpu.core_type<tc>, window_params = [{transform_indices = @transform_0, window_bounds = array<i64: 8, 32, 256>}, {pipeline_mode = #tpu.pipeline_mode<synchronous>, transform_indices = @transform_1, window_bounds = array<i64: 32, 512>}, {pipeline_mode = #tpu.pipeline_mode<synchronous>, transform_indices = @transform_2, window_bounds = array<i64: 1, 512>}, {pipeline_mode = #tpu.pipeline_mode<synchronous>, transform_indices = @transform_3, window_bounds = array<i64: 512, 256>}, {pipeline_mode = #tpu.pipeline_mode<synchronous>, transform_indices = @transform_4, window_bounds = array<i64: 1, 256>}, {pipeline_mode = #tpu.pipeline_mode<synchronous>, transform_indices = @transform_5, window_bounds = array<i64: 256, 128>}, {pipeline_mode = #tpu.pipeline_mode<synchronous>, transform_indices = @transform_6, window_bounds = array<i64: 1, 128>}, {pipeline_mode = #tpu.pipeline_mode<synchronous>, transform_indices = @transform_7, window_bounds = array<i64: 128, 128>}, {pipeline_mode = #tpu.pipeline_mode<synchronous>, transform_indices = @transform_8, window_bounds = array<i64: 1, 128>}, {transform_indices = @transform_9, window_bounds = array<i64: 8, 128>}]} {
    %c0 = arith.constant 0 : index
    %c0_0 = arith.constant 0 : index
    %c0_1 = arith.constant 0 : index
    %0 = vector.load %arg1[%c0, %c0_0, %c0_1] : memref<8x32x256xf32, #tpu.memory_space<vmem>>, vector<8x32x256xf32>
    %cst = arith.constant dense<0.000000e+00> : vector<8x32xf32>
    %1 = vector.multi_reduction <add>, %0, %cst [2] : vector<8x32x256xf32> to vector<8x32xf32>
    %cst_2 = arith.constant 3.906250e-03 : f32
    %2 = vector.broadcast %cst_2 : f32 to vector<8x32xf32>
    %3 = arith.mulf %1, %2 : vector<8x32xf32>
    %4 = arith.truncf %3 : vector<8x32xf32> to vector<8x32xbf16>
    %c0_3 = arith.constant 0 : index
    %c0_4 = arith.constant 0 : index
    %5 = vector.load %arg2[%c0_3, %c0_4] : memref<32x512xbf16, #tpu.memory_space<vmem>>, vector<32x512xbf16>
    %cst_5 = arith.constant dense<0.000000e+00> : vector<8x512xf32>
    %6 = tpu.matmul %4, %5, %cst_5 {dimension_numbers = #tpu.dot_dimension_numbers<[1], [0], [0], [1], [0, 0, 1, 1], [], []>} : vector<8x32xbf16>, vector<32x512xbf16>, vector<8x512xf32> -> vector<8x512xf32>
    %c0_6 = arith.constant 0 : index
    %c0_7 = arith.constant 0 : index
    %7 = vector.load %arg3[%c0_6, %c0_7] : memref<1x512xf32, #tpu.memory_space<vmem>>, vector<1x512xf32>
    %8 = vector.broadcast %7 : vector<1x512xf32> to vector<8x512xf32>
    %9 = arith.addf %6, %8 : vector<8x512xf32>
    %cst_8 = arith.constant 0.000000e+00 : f32
    %10 = vector.broadcast %cst_8 : f32 to vector<8x512xf32>
    %11 = arith.maximumf %9, %10 : vector<8x512xf32>
    %12 = arith.truncf %11 : vector<8x512xf32> to vector<8x512xbf16>
    %c0_9 = arith.constant 0 : index
    %c0_10 = arith.constant 0 : index
    %13 = vector.load %arg4[%c0_9, %c0_10] : memref<512x256xbf16, #tpu.memory_space<vmem>>, vector<512x256xbf16>
    %cst_11 = arith.constant dense<0.000000e+00> : vector<8x256xf32>
    %14 = tpu.matmul %12, %13, %cst_11 {dimension_numbers = #tpu.dot_dimension_numbers<[1], [0], [0], [1], [0, 0, 1, 1], [], []>} : vector<8x512xbf16>, vector<512x256xbf16>, vector<8x256xf32> -> vector<8x256xf32>
    %c0_12 = arith.constant 0 : index
    %c0_13 = arith.constant 0 : index
    %15 = vector.load %arg5[%c0_12, %c0_13] : memref<1x256xf32, #tpu.memory_space<vmem>>, vector<1x256xf32>
    %16 = vector.broadcast %15 : vector<1x256xf32> to vector<8x256xf32>
    %17 = arith.addf %14, %16 : vector<8x256xf32>
    %cst_14 = arith.constant 0.000000e+00 : f32
    %18 = vector.broadcast %cst_14 : f32 to vector<8x256xf32>
    %19 = arith.maximumf %17, %18 : vector<8x256xf32>
    %20 = arith.truncf %19 : vector<8x256xf32> to vector<8x256xbf16>
    %c0_15 = arith.constant 0 : index
    %c0_16 = arith.constant 0 : index
    %21 = vector.load %arg6[%c0_15, %c0_16] : memref<256x128xbf16, #tpu.memory_space<vmem>>, vector<256x128xbf16>
    %cst_17 = arith.constant dense<0.000000e+00> : vector<8x128xf32>
    %22 = tpu.matmul %20, %21, %cst_17 {dimension_numbers = #tpu.dot_dimension_numbers<[1], [0], [0], [1], [0, 0, 1, 1], [], []>} : vector<8x256xbf16>, vector<256x128xbf16>, vector<8x128xf32> -> vector<8x128xf32>
    %c0_18 = arith.constant 0 : index
    %c0_19 = arith.constant 0 : index
    %23 = vector.load %arg7[%c0_18, %c0_19] : memref<1x128xf32, #tpu.memory_space<vmem>>, vector<1x128xf32>
    %24 = vector.broadcast %23 : vector<1x128xf32> to vector<8x128xf32>
    %25 = arith.addf %22, %24 : vector<8x128xf32>
    %cst_20 = arith.constant 0.000000e+00 : f32
    %26 = vector.broadcast %cst_20 : f32 to vector<8x128xf32>
    %27 = arith.maximumf %25, %26 : vector<8x128xf32>
    %28 = arith.truncf %27 : vector<8x128xf32> to vector<8x128xbf16>
    %c0_21 = arith.constant 0 : index
    %c0_22 = arith.constant 0 : index
    %29 = vector.load %arg8[%c0_21, %c0_22] : memref<128x128xbf16, #tpu.memory_space<vmem>>, vector<128x128xbf16>
    %cst_23 = arith.constant dense<0.000000e+00> : vector<8x128xf32>
    %30 = tpu.matmul %28, %29, %cst_23 {dimension_numbers = #tpu.dot_dimension_numbers<[1], [0], [0], [1], [0, 0, 1, 1], [], []>} : vector<8x128xbf16>, vector<128x128xbf16>, vector<8x128xf32> -> vector<8x128xf32>
    %c0_24 = arith.constant 0 : index
    %c0_25 = arith.constant 0 : index
    %31 = vector.load %arg9[%c0_24, %c0_25] : memref<1x128xf32, #tpu.memory_space<vmem>>, vector<1x128xf32>
    %32 = vector.broadcast %31 : vector<1x128xf32> to vector<8x128xf32>
    %33 = arith.addf %30, %32 : vector<8x128xf32>
    %c0_26 = arith.constant 0 : index
    %c0_27 = arith.constant 0 : index
    %34 = vector.load %arg10[%c0_26, %c0_27] : memref<8x128xf32, #tpu.memory_space<vmem>>, vector<8x128xf32>
    tpu.vector_store %arg10[%c0_26, %c0_27], %33 {strides = array<i32>} : memref<8x128xf32, #tpu.memory_space<vmem>>, vector<8x128xf32>,
    return
  }
  func.func @transform_0(%arg0: i32) -> (i32, i32, i32) {
    %c0_i32 = arith.constant 0 : i32
    %c0_i32_0 = arith.constant 0 : i32
    %c0_i32_1 = arith.constant 0 : i32
    return %arg0, %c0_i32, %c0_i32_0 : i32, i32, i32
  }
  func.func @transform_1(%arg0: i32) -> (i32, i32) {
    %c0_i32 = arith.constant 0 : i32
    %c0_i32_0 = arith.constant 0 : i32
    %c0_i32_1 = arith.constant 0 : i32
    return %c0_i32, %c0_i32_0 : i32, i32
  }
  func.func @transform_2(%arg0: i32) -> (i32, i32) {
    %c0_i32 = arith.constant 0 : i32
    %c0_i32_0 = arith.constant 0 : i32
    %c0_i32_1 = arith.constant 0 : i32
    return %c0_i32, %c0_i32_0 : i32, i32
  }
  func.func @transform_3(%arg0: i32) -> (i32, i32) {
    %c0_i32 = arith.constant 0 : i32
    %c0_i32_0 = arith.constant 0 : i32
    %c0_i32_1 = arith.constant 0 : i32
    return %c0_i32, %c0_i32_0 : i32, i32
  }
  func.func @transform_4(%arg0: i32) -> (i32, i32) {
    %c0_i32 = arith.constant 0 : i32
    %c0_i32_0 = arith.constant 0 : i32
    %c0_i32_1 = arith.constant 0 : i32
    return %c0_i32, %c0_i32_0 : i32, i32
  }
  func.func @transform_5(%arg0: i32) -> (i32, i32) {
    %c0_i32 = arith.constant 0 : i32
    %c0_i32_0 = arith.constant 0 : i32
    %c0_i32_1 = arith.constant 0 : i32
    return %c0_i32, %c0_i32_0 : i32, i32
  }
  func.func @transform_6(%arg0: i32) -> (i32, i32) {
    %c0_i32 = arith.constant 0 : i32
    %c0_i32_0 = arith.constant 0 : i32
    %c0_i32_1 = arith.constant 0 : i32
    return %c0_i32, %c0_i32_0 : i32, i32
  }
  func.func @transform_7(%arg0: i32) -> (i32, i32) {
    %c0_i32 = arith.constant 0 : i32
    %c0_i32_0 = arith.constant 0 : i32
    %c0_i32_1 = arith.constant 0 : i32
    return %c0_i32, %c0_i32_0 : i32, i32
  }
  func.func @transform_8(%arg0: i32) -> (i32, i32) {
    %c0_i32 = arith.constant 0 : i32
    %c0_i32_0 = arith.constant 0 : i32
    %c0_i32_1 = arith.constant 0 : i32
    return %c0_i32, %c0_i32_0 : i32, i32
  }
  func.func @transform_9(%arg0: i32) -> (i32, i32) {
    %c0_i32 = arith.constant 0 : i32
    %c0_i32_0 = arith.constant 0 : i32
    return %arg0, %c0_i32 : i32, i32
  }
}

</mosaic_0001>

<bundles_post_ra>
// kernel: tpu_custom_call.1
= control target key start
LH: loop header
LB: loop body
LE: loop exit
PB: predicated region body
PF: predicated region fallthrough
CT: control target
= control target key end

     0   :  { %14 = vsyncpa [#allocation3], 0  ;;  %s2213_s0 = inlined_call_operand.hbm [shape: f32[2,32,256], index: 0, kind: input, shape index: {}]   ;;  %s2214_s1 = inlined_call_operand.hbm [shape: bf16[32,512], index: 1, kind: input, shape index: {}]   ;;  %s2215_s2 = inlined_call_operand.vmem [shape: f32[1,512], index: 2, kind: input, shape index: {}]   ;;  %s2216_s3 = inlined_call_operand.hbm [shape: bf16[512,256], index: 3, kind: input, shape index: {}]   ;;  %s2217_s4 = inlined_call_operand.vmem [shape: f32[1,256], index: 4, kind: input, shape index: {}]   ;;  %s2218_s5 = inlined_call_operand.hbm [shape: bf16[256,128], index: 5, kind: input, shape index: {}]   ;;  %s2219_s6 = inlined_call_operand.vmem [shape: f32[1,128], index: 6, kind: input, shape index: {}]   ;;  %s2220_s7 = inlined_call_operand.hbm [shape: bf16[128,128], index: 7, kind: input, shape index: {}]   ;;  %s2221_s8 = inlined_call_operand.vmem [shape: f32[1,128], index: 8, kind: input, shape index: {}]   ;;  %s2222_s9 = inlined_call_operand.hbm [shape: f32[2,128], index: 9, kind: output, shape index: {}]  }
   0x1   :  { %15 = vsyncpa [#allocation6], 0 }
   0x2   :  { %16 = vsyncpa [#allocation9], 0 }
   0x3   :  { %17 = vsyncpa [#allocation4], 0 }
   0x4   :  { %22 = vsyncadd [#allocation3], 6144  ;;  %s1933_s30 = smov [#allocation5]   ;;  %s1934_s11 = smov [#allocation8]  }
   0x5   :  { %s35_s10 = sshll.u32 %s1933_s30, 4  ;;  %s63_s12 = sshll.u32 %s1934_s11, 4  ;;  %s36_s10 = int_to_ptr.vmem [resolvable:$true] %s35_s10  ;;  %s2000_s12 = int_to_ptr.vmem [resolvable:$true] %s63_s12 }
   0x6   :  { %s1793_s15 = scalar_lea.hbm %s2214_s1, 1024 }
   0x7   :  { %p1794_p0 = scmp.ne.s32.totalorder %s2214_s1, %s1793_s15  ;;  %p1797_p1 = scmp.lt.u32.totalorder %s1793_s15, %s2214_s1 }
   0x9   :  { %p1799_p2 = pnand %p1797_p1, %p1794_p0 }
   0xb   :  { %1802 = shalt.err (!%p1799_p2)
}
   0xc   :  { %s1803_s20 = scalar_lea.vmem %s36_s10, 1024  ;;  %p1808_p4 = scmp.lt.s32.totalorder %s36_s10, %s36_s10 }
   0xd   :  { %p1804_p3 = scmp.ne.s32.totalorder %s36_s10, %s1803_s20  ;;  %p1809_p5 = scmp.lt.s32.totalorder %s1803_s20, %s1803_s20 }
   0xf   :  { %p1810_p6 = por %p1809_p5, %p1808_p4 }
  0x11   :  { %p1811_p7 = pnand %p1810_p6, %p1804_p3 }
  0x13   :  { %1814 = shalt.err (!%p1811_p7)
}
  0x14   :  { %s1935_s21 = smov 256   ;;  %s1936_s22 = smov 16  }
  0x15   :  { %41 = dma.hbm_to_vmem [thread:$0]  %s2214_s1, 1024, %s36_s10, [#allocation6], %s1935_s21, %s1935_s21, %s1936_s22  }
  0x16   :  { %s1815_s27 = scalar_lea.hbm %s2218_s5, 2048 }
  0x17   :  { %p1816_p8 = scmp.ne.s32.totalorder %s2218_s5, %s1815_s27  ;;  %p1819_p9 = scmp.lt.u32.totalorder %s1815_s27, %s2218_s5 }
  0x19   :  { %p1821_p10 = pnand %p1819_p9, %p1816_p8 }
  0x1b   :  { %1824 = shalt.err (!%p1821_p10)
}
  0x1c   :  { %s1825_s13 = scalar_lea.vmem %s2000_s12, 2048  ;;  %p1830_p12 = scmp.lt.s32.totalorder %s2000_s12, %s2000_s12 }
  0x1d   :  { %p1826_p11 = scmp.ne.s32.totalorder %s2000_s12, %s1825_s13  ;;  %p1831_p13 = scmp.lt.s32.totalorder %s1825_s13, %s1825_s13 }
  0x1f   :  { %p1832_p0 = por %p1831_p13, %p1830_p12 }
  0x21   :  { %p1833_p1 = pnand %p1832_p0, %p1826_p11 }
  0x23   :  { %1836 = shalt.err (!%p1833_p1)
}
  0x24   :  { %s1937_s1 = smov 64   ;;  %s1938_s10 = smov 4  }
  0x25   :  { %69 = dma.hbm_to_vmem [thread:$0]  %s2218_s5, 2048, %s2000_s12, [#allocation9], %s1937_s1, %s1937_s1, %s1938_s10  }
  0x26   :  { %s1939_s16 = smov [#allocation2]   ;;  %s1940_s18 = smov [#allocation7]  }
  0x27   :  { %s23_s17 = sshll.u32 %s1939_s16, 4  ;;  %s49_s19 = sshll.u32 %s1940_s18, 4  ;;  %s24_s17 = int_to_ptr.vmem [resolvable:$true] %s23_s17  ;;  %s2037_s19 = int_to_ptr.vmem [resolvable:$true] %s49_s19 }
  0x28   :  { %s1837_s24 = scalar_lea.hbm %s2213_s0, 2048 }
  0x29   :  { %p1838_p2 = scmp.ne.s32.totalorder %s2213_s0, %s1837_s24  ;;  %p1841_p3 = scmp.lt.u32.totalorder %s1837_s24, %s2213_s0 }
  0x2b   :  { %p1843_p4 = pnand %p1841_p3, %p1838_p2 }
  0x2d   :  { %1846 = shalt.err (!%p1843_p4)
}
  0x2e   :  { %s1847_s5 = scalar_lea.vmem %s24_s17, 2048  ;;  %s1851_s12 = scalar_lea.vmem %s24_s17, 8192 }
  0x2f   :  { %p1848_p5 = scmp.ne.s32.totalorder %s24_s17, %s1847_s5  ;;  %p1852_p6 = scmp.lt.s32.totalorder %s24_s17, %s24_s17 }
  0x30   :  { %p1853_p7 = scmp.lt.s32.totalorder %s1851_s12, %s1847_s5 }
  0x32   :  { %p1854_p8 = por %p1853_p7, %p1852_p6 }
  0x34   :  { %p1855_p9 = pnand %p1854_p8, %p1848_p5 }
  0x36   :  { %1858 = shalt.err (!%p1855_p9)
}
  0x37   :  { %29 = dma.hbm_to_vmem [thread:$0]  %s2213_s0, 2048, %s24_s17, [#allocation3], %s1935_s21, %s1935_s21, %s1936_s22  }
  0x38   :  { %s1859_s14 = scalar_lea.hbm %s2216_s3, 8192 }
  0x39   :  { %p1860_p10 = scmp.ne.s32.totalorder %s2216_s3, %s1859_s14  ;;  %p1863_p11 = scmp.lt.u32.totalorder %s1859_s14, %s2216_s3 }
  0x3b   :  { %p1865_p12 = pnand %p1863_p11, %p1860_p10 }
  0x3d   :  { %1868 = shalt.err (!%p1865_p12)
}
  0x3e   :  { %s1869_s23 = scalar_lea.vmem %s2037_s19, 8192  ;;  %p1874_p0 = scmp.lt.s32.totalorder %s2037_s19, %s2037_s19 }
  0x3f   :  { %p1870_p13 = scmp.ne.s32.totalorder %s2037_s19, %s1869_s23  ;;  %p1875_p1 = scmp.lt.s32.totalorder %s1869_s23, %s1869_s23 }
  0x41   :  { %p1876_p2 = por %p1875_p1, %p1874_p0 }
  0x43   :  { %p1877_p3 = pnand %p1876_p2, %p1870_p13 }
  0x45   :  { %1880 = shalt.err (!%p1877_p3)
}
  0x46   :  { %s1941_s0 = smov 128   ;;  %s1942_s21 = smov 8  }
  0x47   :  { %55 = dma.hbm_to_vmem [thread:$0]  %s2216_s3, 8192, %s2037_s19, [#allocation6], %s1941_s0, %s1941_s0, %s1942_s21  }
  0x48   :  { %s1943_s24 = smov [#allocation10]   ;;  %s1881_s28 = scalar_lea.hbm %s2220_s7, 1024 }
  0x49   :  { %s77_s25 = sshll.u32 %s1943_s24, 4  ;;  %p1882_p4 = scmp.ne.s32.totalorder %s2220_s7, %s1881_s28  ;;  %s78_s25 = int_to_ptr.vmem [resolvable:$true] %s77_s25 }
  0x4a   :  { %p1885_p5 = scmp.lt.u32.totalorder %s1881_s28, %s2220_s7 }
  0x4c   :  { %p1887_p6 = pnand %p1885_p5, %p1882_p4 }
  0x4e   :  { %1890 = shalt.err (!%p1887_p6)
}
  0x4f   :  { %s1891_s11 = scalar_lea.vmem %s78_s25, 1024  ;;  %p1896_p8 = scmp.lt.s32.totalorder %s78_s25, %s78_s25 }
  0x50   :  { %p1892_p7 = scmp.ne.s32.totalorder %s78_s25, %s1891_s11  ;;  %p1897_p9 = scmp.lt.s32.totalorder %s1891_s11, %s1891_s11 }
  0x52   :  { %p1898_p10 = por %p1897_p9, %p1896_p8 }
  0x54   :  { %p1899_p11 = pnand %p1898_p10, %p1892_p7 }
  0x56   :  { %1902 = shalt.err (!%p1899_p11)
}
  0x57   :  { %83 = dma.hbm_to_vmem [thread:$0]  %s2220_s7, 1024, %s78_s25, [#allocation9], %s1937_s1, %s1937_s1, %s1938_s10  }
  0x58   :  { %1925 = dma.done.wait [#allocation3], 8192  }
  0x59   :  { %1926 = vsyncadd [#allocation3], 4294959104 }
  0x5a   :  { %1927 = dma.done.wait [#allocation6], 9216  }
  0x5b   :  { %1928 = vsyncadd [#allocation6], 4294958080 }
  0x5c   :  { %1929 = dma.done.wait [#allocation9], 3072  }
  0x5d   :  { %1930 = vsyncadd [#allocation9], 4294964224  ;;  %v110_v0 = vld [vmem:[#allocation2 + $0x40] sm:$0xff]  ;;  %v111_v1 = vld [vmem:[#allocation2 + $0x48] sm:$0xff]  ;;  %vm399_vm0 = vcmask 130112   ;;  %vm406_vm1 = vcmask 195712  }
  0x5e   :  { %v102_v2 = vld [vmem:[#allocation2] sm:$0xff]  ;;  %v178_v3 = vadd.f32 %v111_v1, %v110_v0  ;;  %v103_v4 = vld [vmem:[#allocation2 + $0x8] sm:$0xff]  ;;  %v112_v5 = vld [vmem:[#allocation2 + $0x50] sm:$0xff]  ;;  %vm413_vm2 = vcmask 261312   ;;  %vm548_vm3 = vcmask 1041409   ;;  %vm550_vm4 = vcmask 1042434  }
  0x5f   :  { %v113_v6 = vld [vmem:[#allocation2 + $0x58] sm:$0xff]  ;;  %v166_v7 = vadd.f32 %v103_v4, %v102_v2  ;;  %v104_v8 = vld [vmem:[#allocation2 + $0x10] sm:$0xff]  ;;  %v106_v14 = vld [vmem:[#allocation2 + $0x20] sm:$0xff]  ;;  %vm552_vm5 = vcmask 1043459   ;;  %vm554_vm6 = vcmask 1044484   ;;  %vm556_vm7 = vcmask 1045509  }
  0x60   :  { %v105_v9 = vld [vmem:[#allocation2 + $0x18] sm:$0xff]  ;;  %179 = vadd.xlane.f32.xlu1 %v178_v3  ;;  %v181_v10 = vadd.f32 %v113_v6, %v112_v5  ;;  %v108_v12 = vld [vmem:[#allocation2 + $0x30] sm:$0xff]  ;;  %v107_v15 = vld [vmem:[#allocation2 + $0x28] sm:$0xff]  ;;  %vm558_vm8 = vcmask 1046534   ;;  %vm560_vm9 = vcmask 1047559   ;;  %vm603_vm10 = vcmask 261120  }
  0x61   :  { %167 = vadd.xlane.f32.xlu0 %v166_v7  ;;  %v169_v11 = vadd.f32 %v105_v9, %v104_v8  ;;  %v109_v13 = vld [vmem:[#allocation2 + $0x38] sm:$0xff]  ;;  %v172_v17 = vadd.f32 %v107_v15, %v106_v14  ;;  %v116_v18 = vld [vmem:[#allocation2 + $0x70] sm:$0xff]  ;;  %v114_v20 = vld [vmem:[#allocation2 + $0x60] sm:$0xff]  ;;  %vm1946_vm11 = vmmov 0  }
  0x62   :  { %v175_v16 = vadd.f32 %v109_v13, %v108_v12  ;;  %v117_v19 = vld [vmem:[#allocation2 + $0x78] sm:$0xff]  ;;  %v115_v21 = vld [vmem:[#allocation2 + $0x68] sm:$0xff]  ;;  %v120_v24 = vld [vmem:[#allocation2 + $0x90] sm:$0xff] }
  0x63   :  { %v187_v22 = vadd.f32 %v117_v19, %v116_v18  ;;  %v184_v23 = vadd.f32 %v115_v21, %v114_v20  ;;  %v121_v25 = vld [vmem:[#allocation2 + $0x98] sm:$0xff]  ;;  %v118_v26 = vld [vmem:[#allocation2 + $0x80] sm:$0xff]  ;;  %v119_v27 = vld [vmem:[#allocation2 + $0x88] sm:$0xff] }
  0x64   :  { %182 = vadd.xlane.f32.xlu1 %v181_v10  ;;  %v193_v28 = vadd.f32 %v121_v25, %v120_v24  ;;  %v190_v29 = vadd.f32 %v119_v27, %v118_v26  ;;  %v124_v30 = vld [vmem:[#allocation2 + $0xb0] sm:$0xff]  ;;  %v125_v31 = vld [vmem:[#allocation2 + $0xb8] sm:$0xff]  ;;  %v122_v32 = vld [vmem:[#allocation2 + $0xa0] sm:$0xff] }
  0x65   :  { %170 = vadd.xlane.f32.xlu0 %v169_v11  ;;  %v123_v33 = vld [vmem:[#allocation2 + $0xa8] sm:$0xff]  ;;  %v199_v34 = vadd.f32 %v125_v31, %v124_v30  ;;  %v128_v36 = vld [vmem:[#allocation2 + $0xd0] sm:$0xff]  ;;  %v129_v37 = vld [vmem:[#allocation2 + $0xd8] sm:$0xff] }
  0x66   :  { %v196_v35 = vadd.f32 %v123_v33, %v122_v32  ;;  %v126_v38 = vld [vmem:[#allocation2 + $0xc0] sm:$0xff]  ;;  %v127_v39 = vld [vmem:[#allocation2 + $0xc8] sm:$0xff]  ;;  %v132_v40 = vld [vmem:[#allocation2 + $0xf0] sm:$0xff]  ;;  %v205_v42 = vadd.f32 %v129_v37, %v128_v36  ;;  %v1944_v36 = vmov 0  }
  0x67   :  { %v133_v41 = vld [vmem:[#allocation2 + $0xf8] sm:$0xff]  ;;  %v130_v43 = vld [vmem:[#allocation2 + $0xe0] sm:$0xff]  ;;  %v131_v44 = vld [vmem:[#allocation2 + $0xe8] sm:$0xff]  ;;  %v202_v45 = vadd.f32 %v127_v39, %v126_v38  ;;  %639 = vmatprep.mubr.bf16.mxu1 %v1944_v36 }
  0x68   :  { %176 = vadd.xlane.f32.xlu1 %v175_v16  ;;  %v136_v46 = vld [vmem:[#allocation2 + $0x110] sm:$0xff]  ;;  %v137_v47 = vld [vmem:[#allocation2 + $0x118] sm:$0xff]  ;;  %v211_v48 = vadd.f32 %v133_v41, %v132_v40  ;;  %v134_v49 = vld [vmem:[#allocation2 + $0x100] sm:$0xff]  ;;  %v208_v51 = vadd.f32 %v131_v44, %v130_v43 }
  0x69   :  { %173 = vadd.xlane.f32.xlu0 %v172_v17  ;;  %v135_v50 = vld [vmem:[#allocation2 + $0x108] sm:$0xff]  ;;  %v140_v52 = vld [vmem:[#allocation2 + $0x130] sm:$0xff]  ;;  %v141_v53 = vld [vmem:[#allocation2 + $0x138] sm:$0xff]  ;;  %v217_v54 = vadd.f32 %v137_v47, %v136_v46 }
  0x6a   :  { %v138_v55 = vld [vmem:[#allocation2 + $0x120] sm:$0xff]  ;;  %v139_v56 = vld [vmem:[#allocation2 + $0x128] sm:$0xff]  ;;  %v214_v57 = vadd.f32 %v135_v50, %v134_v49  ;;  %v144_v58 = vld [vmem:[#allocation2 + $0x150] sm:$0xff]  ;;  %v223_v60 = vadd.f32 %v141_v53, %v140_v52 }
  0x6b   :  { %v145_v59 = vld [vmem:[#allocation2 + $0x158] sm:$0xff]  ;;  %v142_v61 = vld [vmem:[#allocation2 + $0x140] sm:$0xff]  ;;  %v143_v62 = vld [vmem:[#allocation2 + $0x148] sm:$0xff]  ;;  %v220_v63 = vadd.f32 %v139_v56, %v138_v55 }
  0x6c   :  { %188 = vadd.xlane.f32.xlu1 %v187_v22  ;;  %v148_v0 = vld [vmem:[#allocation2 + $0x170] sm:$0xff]  ;;  %v149_v1 = vld [vmem:[#allocation2 + $0x178] sm:$0xff]  ;;  %v229_v2 = vadd.f32 %v145_v59, %v144_v58  ;;  %v146_v3 = vld [vmem:[#allocation2 + $0x160] sm:$0xff]  ;;  %v226_v5 = vadd.f32 %v143_v62, %v142_v61 }
  0x6d   :  { %185 = vadd.xlane.f32.xlu0 %v184_v23  ;;  %v147_v4 = vld [vmem:[#allocation2 + $0x168] sm:$0xff]  ;;  %v152_v6 = vld [vmem:[#allocation2 + $0x190] sm:$0xff]  ;;  %v153_v7 = vld [vmem:[#allocation2 + $0x198] sm:$0xff]  ;;  %v235_v8 = vadd.f32 %v149_v1, %v148_v0 }
  0x6e   :  { %v150_v9 = vld [vmem:[#allocation2 + $0x180] sm:$0xff]  ;;  %v151_v10 = vld [vmem:[#allocation2 + $0x188] sm:$0xff]  ;;  %v232_v11 = vadd.f32 %v147_v4, %v146_v3  ;;  %v156_v12 = vld [vmem:[#allocation2 + $0x1b0] sm:$0xff]  ;;  %v241_v14 = vadd.f32 %v153_v7, %v152_v6 }
  0x6f   :  { %v157_v13 = vld [vmem:[#allocation2 + $0x1b8] sm:$0xff]  ;;  %v154_v15 = vld [vmem:[#allocation2 + $0x1a0] sm:$0xff]  ;;  %v155_v16 = vld [vmem:[#allocation2 + $0x1a8] sm:$0xff]  ;;  %v238_v17 = vadd.f32 %v151_v10, %v150_v9 }
  0x70   :  { %194 = vadd.xlane.f32.xlu1 %v193_v28  ;;  %v160_v18 = vld [vmem:[#allocation2 + $0x1d0] sm:$0xff]  ;;  %v161_v19 = vld [vmem:[#allocation2 + $0x1d8] sm:$0xff]  ;;  %v247_v20 = vadd.f32 %v157_v13, %v156_v12  ;;  %v158_v21 = vld [vmem:[#allocation2 + $0x1c0] sm:$0xff]  ;;  %v244_v23 = vadd.f32 %v155_v16, %v154_v15 }
  0x71   :  { %191 = vadd.xlane.f32.xlu0 %v190_v29  ;;  %v159_v22 = vld [vmem:[#allocation2 + $0x1c8] sm:$0xff]  ;;  %v164_v24 = vld [vmem:[#allocation2 + $0x1f0] sm:$0xff]  ;;  %v165_v25 = vld [vmem:[#allocation2 + $0x1f8] sm:$0xff]  ;;  %v253_v26 = vadd.f32 %v161_v19, %v160_v18 }
  0x72   :  { %v162_v27 = vld [vmem:[#allocation2 + $0x1e0] sm:$0xff]  ;;  %v163_v28 = vld [vmem:[#allocation2 + $0x1e8] sm:$0xff]  ;;  %v250_v29 = vadd.f32 %v159_v22, %v158_v21  ;;  %v259_v30 = vadd.f32 %v165_v25, %v164_v24  ;;  %v1676_v40 = vld [vmem:[#allocation7 + $0x14] ss:$8 sps:$4 sm:$0xff]  }
  0x73   :  { %v256_v31 = vadd.f32 %v163_v28, %v162_v27  ;;  %v1661_v32 = vld [vmem:[#allocation5 + $0x4] ss:$16 sps:$4 sm:$0xff]   ;;  %v1663_v33 = vld [vmem:[#allocation5] ss:$16 sps:$4 sm:$0xff]   ;;  %v1669_v37 = vld [vmem:[#allocation5 + $0xc] ss:$16 sps:$4 sm:$0xff]  }
  0x74   :  { %200 = vadd.xlane.f32.xlu1 %v199_v34  ;;  %607 = vmatprep.subr.bf16.mxu1 %v1661_v32  ;;  %v1664_v34 = vld [vmem:[#allocation5 + $0x24] ss:$16 sps:$4 sm:$0xff]   ;;  %v1675_v39 = vld [vmem:[#allocation7] ss:$8 sps:$4 sm:$0xff]   ;;  %v1678_v41 = vld [vmem:[#allocation7 + $0x10] ss:$8 sps:$4 sm:$0xff]  }
  0x75   :  { %197 = vadd.xlane.f32.xlu0 %v196_v35  ;;  %608 = vmatpush1.bf16.msra.mxu1 %v1663_v33  ;;  %v1666_v35 = vld [vmem:[#allocation5 + $0x20] ss:$16 sps:$4 sm:$0xff]   ;;  %v1673_v38 = vld [vmem:[#allocation7 + $0x4] ss:$8 sps:$4 sm:$0xff]   ;;  %v1682_v44 = vld [vmem:[#allocation7 + $0x34] ss:$8 sps:$4 sm:$0xff]  }
  0x76   :  { %609 = vmatprep.subr.bf16.mxu1 %v1664_v34  ;;  %1093 = vmatprep.subr.bf16.mxu0 %v1673_v38  ;;  %v1681_v43 = vld [vmem:[#allocation7 + $0x20] ss:$8 sps:$4 sm:$0xff]   ;;  %v1685_v46 = vld [vmem:[#allocation7 + $0x44] ss:$8 sps:$4 sm:$0xff]   ;;  %v1690_v49 = vld [vmem:[#allocation7 + $0x50] ss:$8 sps:$4 sm:$0xff]  }
  0x77   :  { %1094 = vmatpush1.bf16.msra.mxu0 %v1675_v39  ;;  %v1687_v47 = vld [vmem:[#allocation7 + $0x40] ss:$8 sps:$4 sm:$0xff]   ;;  %v1691_v50 = vld [vmem:[#allocation7 + $0x64] ss:$8 sps:$4 sm:$0xff]   ;;  %v1694_v52 = vld [vmem:[#allocation7 + $0x74] ss:$8 sps:$4 sm:$0xff]  }
  0x78   :  { %206 = vadd.xlane.f32.xlu1 %v205_v42  ;;  %1095 = vmatprep.subr.bf16.mxu0 %v1676_v40  ;;  %v1679_v42 = vld [vmem:[#allocation7 + $0x24] ss:$8 sps:$4 sm:$0xff]   ;;  %v1696_v53 = vld [vmem:[#allocation7 + $0x70] ss:$8 sps:$4 sm:$0xff]   ;;  %v1699_v55 = vld [vmem:[#allocation7 + $0x80] ss:$8 sps:$4 sm:$0xff]  }
  0x79   :  { %203 = vadd.xlane.f32.xlu0 %v202_v45  ;;  %610 = vmatpush1.bf16.msra.mxu1 %v1666_v35  ;;  %v1684_v45 = vld [vmem:[#allocation7 + $0x30] ss:$8 sps:$4 sm:$0xff]   ;;  %v1700_v56 = vld [vmem:[#allocation7 + $0x94] ss:$8 sps:$4 sm:$0xff]   ;;  %v1703_v58 = vld [vmem:[#allocation7 + $0xa4] ss:$8 sps:$4 sm:$0xff]  }
  0x7a   :  { %648 = vmatprep.subr.bf16.mxu1 %v1669_v37  ;;  %v1705_v59 = vld [vmem:[#allocation7 + $0xa0] ss:$8 sps:$4 sm:$0xff]   ;;  %v1708_v61 = vld [vmem:[#allocation7 + $0xb0] ss:$8 sps:$4 sm:$0xff]   ;;  %v1709_v62 = vld [vmem:[#allocation7 + $0xc4] ss:$8 sps:$4 sm:$0xff]  }
  0x7b   :  { %1096 = vmatpush1.bf16.msra.mxu0 %v1678_v41  ;;  %v1711_v1 = vld [vmem:[#allocation7 + $0xc0] ss:$8 sps:$4 sm:$0xff]  }
  0x7c   :  { %212 = vadd.xlane.f32.xlu1 %v211_v48  ;;  %1097 = vmatprep.subr.bf16.mxu0 %v1679_v42  ;;  %v1688_v48 = vld [vmem:[#allocation7 + $0x54] ss:$8 sps:$4 sm:$0xff]  }
  0x7d   :  { %209 = vadd.xlane.f32.xlu0 %v208_v51  ;;  %v1693_v51 = vld [vmem:[#allocation7 + $0x60] ss:$8 sps:$4 sm:$0xff]  }
  0x7f   :  { %1098 = vmatpush1.bf16.msra.mxu0 %v1681_v43 }
  0x80   :  { %218 = vadd.xlane.f32.xlu1 %v217_v54  ;;  %1099 = vmatprep.subr.bf16.mxu0 %v1682_v44  ;;  %v1697_v54 = vld [vmem:[#allocation7 + $0x84] ss:$8 sps:$4 sm:$0xff]  }
  0x81   :  { %215 = vadd.xlane.f32.xlu0 %v214_v57  ;;  %v1702_v57 = vld [vmem:[#allocation7 + $0x90] ss:$8 sps:$4 sm:$0xff]  }
  0x83   :  { %1100 = vmatpush1.bf16.msra.mxu0 %v1684_v45 }
  0x84   :  { %224 = vadd.xlane.f32.xlu1 %v223_v60  ;;  %1101 = vmatprep.subr.bf16.mxu0 %v1685_v46  ;;  %v1706_v60 = vld [vmem:[#allocation7 + $0xb4] ss:$8 sps:$4 sm:$0xff]  }
  0x85   :  { %221 = vadd.xlane.f32.xlu0 %v220_v63 }
  0x87   :  { %1102 = vmatpush1.bf16.msra.mxu0 %v1687_v47 }
  0x88   :  { %230 = vadd.xlane.f32.xlu1 %v229_v2  ;;  %1103 = vmatprep.subr.bf16.mxu0 %v1688_v48  ;;  %v1712_v2 = vld [vmem:[#allocation7 + $0xd4] ss:$8 sps:$4 sm:$0xff]  }
  0x89   :  { %227 = vadd.xlane.f32.xlu0 %v226_v5  ;;  %v1714_v5 = vld [vmem:[#allocation7 + $0xd0] ss:$8 sps:$4 sm:$0xff]  }
  0x8b   :  { %1104 = vmatpush1.bf16.msra.mxu0 %v1690_v49 }
  0x8c   :  { %236 = vadd.xlane.f32.xlu1 %v235_v8  ;;  %1105 = vmatprep.subr.bf16.mxu0 %v1691_v50 }
  0x8d   :  { %233 = vadd.xlane.f32.xlu0 %v232_v11 }
  0x8f   :  { %1106 = vmatpush1.bf16.msra.mxu0 %v1693_v51 }
  0x90   :  { %242 = vadd.xlane.f32.xlu1 %v241_v14  ;;  %1107 = vmatprep.subr.bf16.mxu0 %v1694_v52  ;;  %v320_v14 = vlaneseq }
  0x91   :  { %239 = vadd.xlane.f32.xlu0 %v238_v17 }
  0x92   :  { %v389_v17 = vand.u32 127, %v320_v14 }
  0x93   :  { %1108 = vmatpush1.bf16.msra.mxu0 %v1696_v53 }
  0x94   :  { %248 = vadd.xlane.f32.xlu1 %v247_v20  ;;  %1109 = vmatprep.subr.bf16.mxu0 %v1697_v54  ;;  %v394_v27 = vadd.s32 4294967288, %v389_v17  ;;  %v408_v33 = vadd.s32 4294967272, %v389_v17 }
  0x95   :  { %245 = vadd.xlane.f32.xlu0 %v244_v23 }
  0x97   :  { %1110 = vmatpush1.bf16.msra.mxu0 %v1699_v55 }
  0x98   :  { %254 = vadd.xlane.f32.xlu1 %v253_v26  ;;  %1111 = vmatprep.subr.bf16.mxu0 %v1700_v56  ;;  %v2087_v26 = vshrl.u32 %v320_v14, 7 }
  0x99   :  { %251 = vadd.xlane.f32.xlu0 %v250_v29 }
  0x9a   :  { %v2090_v38 = vsub.s32 %v389_v17, %v2087_v26  ;;  %v2093_v39 = vsub.s32 %v394_v27, %v2087_v26  ;;  %v2099_v49 = vsub.s32 %v408_v33, %v2087_v26 }
  0x9b   :  { %1112 = vmatpush1.bf16.msra.mxu0 %v1702_v57 }
  0x9c   :  { %260 = vadd.xlane.f32.xlu1 %v259_v30  ;;  %1113 = vmatprep.subr.bf16.mxu0 %v1703_v58  ;;  %v401_v30 = vadd.s32 4294967280, %v389_v17 }
  0x9d   :  { %257 = vadd.xlane.f32.xlu0 %v256_v31 }
  0x9e   :  { %v2096_v44 = vsub.s32 %v401_v30, %v2087_v26 }
  0x9f   :  { %1114 = vmatpush1.bf16.msra.mxu0 %v1705_v59 }
  0xa0   :  { %1115 = vmatprep.subr.bf16.mxu0 %v1706_v60 }
  0xa3   :  { %1116 = vmatpush1.bf16.msra.mxu0 %v1708_v61 }
  0xa4   :  { %1117 = vmatprep.subr.bf16.mxu0 %v1709_v62 }
  0xa7   :  { %1118 = vmatpush1.bf16.msra.mxu0 %v1711_v1 }
  0xa8   :  { %1119 = vmatprep.subr.bf16.mxu0 %v1712_v2 }
  0xab   :  { %1120 = vmatpush1.bf16.msra.mxu0 %v1714_v5 }
  0xed   :  { %v180_v63 = vpop.xlane.xlu1 %179 }
  0xee   :  { %v168_v0 = vpop.xlane.xlu0 %167  ;;  %v266_v24 = vmul.f32 0.00390625, %v180_v63 }
  0xef   :  { %v262_v22 = vmul.f32 0.00390625, %v168_v0 }
  0xf1   :  { %v183_v3 = vpop.xlane.xlu1 %182 }
  0xf2   :  { %v171_v4 = vpop.xlane.xlu0 %170  ;;  %v267_v19 = vmul.f32 0.00390625, %v183_v3 }
  0xf3   :  { %v263_v18 = vmul.f32 0.00390625, %v171_v4 }
  0xf4   :  { %v296_v29 = vpack.c.bf16 %v267_v19, %v266_v24 }
  0xf5   :  { %v177_v6 = vpop.xlane.xlu1 %176  ;;  %v294_v28 = vpack.c.bf16 %v263_v18, %v262_v22 }
  0xf6   :  { %v174_v7 = vpop.xlane.xlu0 %173  ;;  %v265_v20 = vmul.f32 0.00390625, %v177_v6  ;;  %v360_v42 = vunpack.c.l.b16 %v296_v29  ;;  %v361_v43 = vunpack.c.h.b16 %v296_v29 }
  0xf7   :  { %v264_v21 = vmul.f32 0.00390625, %v174_v7  ;;  %v356_v40 = vunpack.c.l.b16 %v294_v28  ;;  %v357_v41 = vunpack.c.h.b16 %v294_v28 }
  0xf8   :  { %v418_v58 = vrot.slane %v360_v42, %v2090_v38  ;;  %v422_v59 = vrot.slane %v361_v43, %v2093_v39 }
  0xf9   :  { %v189_v8 = vpop.xlane.xlu1 %188  ;;  %v295_v31 = vpack.c.bf16 %v265_v20, %v264_v21  ;;  %v393_v54 = vrot.slane %v356_v40, %v2090_v38  ;;  %v398_v55 = vrot.slane %v357_v41, %v2093_v39 }
  0xfa   :  { %v186_v9 = vpop.xlane.xlu0 %185  ;;  %v269_v34 = vmul.f32 0.00390625, %v189_v8  ;;  %v423_v5 = vsel %vm399_vm0, %v422_v59, %v418_v58 }
  0xfb   :  { %v268_v35 = vmul.f32 0.00390625, %v186_v9  ;;  %v358_v45 = vunpack.c.l.b16 %v295_v31  ;;  %v359_v60 = vunpack.c.h.b16 %v295_v31  ;;  %v400_v3 = vsel %vm399_vm0, %v398_v55, %v393_v54 }
  0xfd   :  { %v195_v10 = vpop.xlane.xlu1 %194  ;;  %v297_v50 = vpack.c.bf16 %v269_v34, %v268_v35  ;;  %v405_v61 = vrot.slane %v358_v45, %v2096_v44  ;;  %v412_v7 = vrot.slane %v359_v60, %v2099_v49 }
  0xfe   :  { %v192_v11 = vpop.xlane.xlu0 %191  ;;  %v271_v46 = vmul.f32 0.00390625, %v195_v10 }
  0xff   :  { %v270_v47 = vmul.f32 0.00390625, %v192_v11  ;;  %v362_v0 = vunpack.c.l.b16 %v297_v50  ;;  %v407_v6 = vsel %vm406_vm1, %v405_v61, %v400_v3  ;;  %v363_v8 = vunpack.c.h.b16 %v297_v50 }
 0x101   :  { %v201_v12 = vpop.xlane.xlu1 %200  ;;  %v298_v62 = vpack.c.bf16 %v271_v46, %v270_v47  ;;  %v427_v14 = vrot.slane %v362_v0, %v2096_v44  ;;  %v432_v30 = vrot.slane %v363_v8, %v2099_v49 }
 0x102   :  { %v198_v13 = vpop.xlane.xlu0 %197  ;;  %v273_v51 = vmul.f32 0.00390625, %v201_v12 }
 0x103   :  { %v272_v52 = vmul.f32 0.00390625, %v198_v13  ;;  %v364_v9 = vunpack.c.l.b16 %v298_v62  ;;  %v365_v10 = vunpack.c.h.b16 %v298_v62  ;;  %v428_v34 = vsel %vm406_vm1, %v427_v14, %v423_v5 }
 0x105   :  { %v207_v15 = vpop.xlane.xlu1 %206  ;;  %v299_v1 = vpack.c.bf16 %v273_v51, %v272_v52  ;;  %v2122_v51 = vsel %vm413_vm2, %v432_v30, %v428_v34 }
 0x106   :  { %v204_v16 = vpop.xlane.xlu0 %203  ;;  %v275_v56 = vmul.f32 0.00390625, %v207_v15 }
 0x107   :  { %v274_v57 = vmul.f32 0.00390625, %v204_v16  ;;  %v366_v15 = vunpack.c.l.b16 %v299_v1  ;;  %v367_v41 = vunpack.c.h.b16 %v299_v1 }
 0x109   :  { %v213_v23 = vpop.xlane.xlu1 %212  ;;  %v300_v4 = vpack.c.bf16 %v275_v56, %v274_v57  ;;  %v446_v42 = vrot.slane %v366_v15, %v2096_v44  ;;  %v451_v62 = vrot.slane %v367_v41, %v2099_v49 }
 0x10a   :  { %v210_v25 = vpop.xlane.xlu0 %209  ;;  %v277_v11 = vmul.f32 0.00390625, %v213_v23  ;;  %v437_v23 = vrot.slane %v364_v9, %v2090_v38 }
 0x10b   :  { %v276_v12 = vmul.f32 0.00390625, %v210_v25  ;;  %v368_v19 = vunpack.c.l.b16 %v300_v4  ;;  %v369_v20 = vunpack.c.h.b16 %v300_v4  ;;  %v441_v25 = vrot.slane %v365_v10, %v2093_v39 }
 0x10d   :  { %v219_v32 = vpop.xlane.xlu1 %218  ;;  %v301_v31 = vpack.c.bf16 %v277_v11, %v276_v12  ;;  %v456_v46 = vrot.slane %v368_v19, %v2090_v38  ;;  %v460_v47 = vrot.slane %v369_v20, %v2093_v39  ;;  %v442_v52 = vsel %vm399_vm0, %v441_v25, %v437_v23 }
 0x10e   :  { %v216_v37 = vpop.xlane.xlu0 %215  ;;  %v279_v16 = vmul.f32 0.00390625, %v219_v32  ;;  %v2115_v32 = vsel %vm413_vm2, %v412_v7, %v407_v6  ;;  %v447_v61 = vsel %vm406_vm1, %v446_v42, %v442_v52 }
 0x10f   :  { %v278_v17 = vmul.f32 0.00390625, %v216_v37  ;;  %v371_v56 = vunpack.c.h.b16 %v301_v31  ;;  %v461_v1 = vsel %vm399_vm0, %v460_v47, %v456_v46  ;;  %v452_v42 = vsel %vm413_vm2, %v451_v62, %v447_v61 }
 0x111   :  { %v225_v48 = vpop.xlane.xlu1 %224  ;;  %v302_v35 = vpack.c.bf16 %v279_v16, %v278_v17  ;;  %v470_v10 = vrot.slane %v371_v56, %v2099_v49 }
 0x112   :  { %v222_v53 = vpop.xlane.xlu0 %221  ;;  %v281_v21 = vmul.f32 0.00390625, %v225_v48 }
 0x113   :  { %v280_v22 = vmul.f32 0.00390625, %v222_v53  ;;  %v370_v53 = vunpack.c.l.b16 %v301_v31  ;;  %v372_v57 = vunpack.c.l.b16 %v302_v35  ;;  %v373_v58 = vunpack.c.h.b16 %v302_v35 }
 0x115   :  { %v231_v63 = vpop.xlane.xlu1 %230  ;;  %v303_v43 = vpack.c.bf16 %v281_v21, %v280_v22  ;;  %v465_v5 = vrot.slane %v370_v53, %v2096_v44  ;;  %v475_v11 = vrot.slane %v372_v57, %v2090_v38  ;;  %v479_v12 = vrot.slane %v373_v58, %v2093_v39 }
 0x116   :  { %v228_v2 = vpop.xlane.xlu0 %227  ;;  %v283_v24 = vmul.f32 0.00390625, %v231_v63  ;;  %v549_v57 = vsel %vm548_vm3, %v2122_v51, %v2115_v32 }
 0x117   :  { %v282_v27 = vmul.f32 0.00390625, %v228_v2  ;;  %v374_v63 = vunpack.c.l.b16 %v303_v43  ;;  %v375_v15 = vunpack.c.h.b16 %v303_v43  ;;  %v466_v23 = vsel %vm406_vm1, %v465_v5, %v461_v1 }
 0x118   :  { %v480_v25 = vsel %vm399_vm0, %v479_v12, %v475_v11  ;;  %v471_v53 = vsel %vm413_vm2, %v470_v10, %v466_v23  ;;  %v551_v61 = vsel %vm550_vm4, %v452_v42, %v549_v57  ;;  %v1718_v10 = vld [vmem:[#allocation7 + $0xf4] ss:$8 sps:$4 sm:$0xff]   ;;  %v1720_v11 = vld [vmem:[#allocation7 + $0xf0] ss:$8 sps:$4 sm:$0xff]   ;;  %v1723_v12 = vld [vmem:[#allocation7 + $0x104] ss:$8 sps:$4 sm:$0xff]  }
 0x119   :  { %v237_v13 = vpop.xlane.xlu1 %236  ;;  %v304_v48 = vpack.c.bf16 %v283_v24, %v282_v27  ;;  %v484_v16 = vrot.slane %v374_v63, %v2096_v44  ;;  %v489_v35 = vrot.slane %v375_v15, %v2099_v49  ;;  %v553_v63 = vsel %vm552_vm5, %v471_v53, %v551_v61  ;;  %v1771_v15 = vld [vmem:[#allocation8 + $0x48] sm:$0xff]   ;;  %v1732_v61 = vld [vmem:[#allocation7 + $0x134] ss:$8 sps:$4 sm:$0xff]  }
 0x11a   :  { %v234_v18 = vpop.xlane.xlu0 %233  ;;  %v285_v28 = vmul.f32 0.00390625, %v237_v13  ;;  %v1729_v57 = vld [vmem:[#allocation7 + $0x124] ss:$8 sps:$4 sm:$0xff]  }
 0x11b   :  { %v284_v29 = vmul.f32 0.00390625, %v234_v18  ;;  %v376_v2 = vunpack.c.l.b16 %v304_v48  ;;  %v377_v3 = vunpack.c.h.b16 %v304_v48  ;;  %v485_v43 = vsel %vm406_vm1, %v484_v16, %v480_v25  ;;  %v1772_v16 = vld [vmem:[#allocation8 + $0x8] sm:$0xff]  }
 0x11c   :  { %v490_v58 = vsel %vm413_vm2, %v489_v35, %v485_v43 }
 0x11d   :  { %v243_v33 = vpop.xlane.xlu1 %242  ;;  %v305_v50 = vpack.c.bf16 %v285_v28, %v284_v29  ;;  %v494_v19 = vrot.slane %v376_v2, %v2090_v38  ;;  %v498_v20 = vrot.slane %v377_v3, %v2093_v39  ;;  %v555_v32 = vsel %vm554_vm6, %v490_v58, %v553_v63  ;;  %v1735_v63 = vld [vmem:[#allocation7 + $0x144] ss:$8 sps:$4 sm:$0xff]  }
 0x11e   :  { %v287_v37 = vmul.f32 0.00390625, %v243_v33  ;;  %v240_v40 = vpop.xlane.xlu0 %239 }
 0x11f   :  { %v286_v45 = vmul.f32 0.00390625, %v240_v40  ;;  %v378_v4 = vunpack.c.l.b16 %v305_v50  ;;  %v379_v21 = vunpack.c.h.b16 %v305_v50 }
 0x121   :  { %v306_v54 = vpack.c.bf16 %v287_v37, %v286_v45  ;;  %v249_v55 = vpop.xlane.xlu1 %248  ;;  %v503_v22 = vrot.slane %v378_v4, %v2096_v44  ;;  %v499_v45 = vsel %vm399_vm0, %v498_v20, %v494_v19  ;;  %v508_v46 = vrot.slane %v379_v21, %v2099_v49  ;;  %v1776_v19 = vld [vmem:[#allocation8 + $0x18] sm:$0xff]   ;;  %v1777_v20 = vld [vmem:[#allocation8 + $0x60] sm:$0xff]  }
 0x122   :  { %v289_v59 = vmul.f32 0.00390625, %v249_v55  ;;  %v246_v60 = vpop.xlane.xlu0 %245  ;;  %v1778_v21 = vld [vmem:[#allocation8 + $0x20] sm:$0xff]  }
 0x123   :  { %v288_v0 = vmul.f32 0.00390625, %v246_v60  ;;  %v380_v6 = vunpack.c.l.b16 %v306_v54  ;;  %v381_v7 = vunpack.c.h.b16 %v306_v54  ;;  %v504_v47 = vsel %vm406_vm1, %v503_v22, %v499_v45  ;;  %v1779_v22 = vld [vmem:[#allocation8 + $0x68] sm:$0xff]  }
 0x124   :  { %v509_v62 = vsel %vm413_vm2, %v508_v46, %v504_v47  ;;  %v1721_v45 = vld [vmem:[#allocation7 + $0x100] ss:$8 sps:$4 sm:$0xff]  }
 0x125   :  { %v307_v8 = vpack.c.bf16 %v289_v59, %v288_v0  ;;  %v255_v9 = vpop.xlane.xlu1 %254  ;;  %v513_v24 = vrot.slane %v380_v6, %v2090_v38  ;;  %v517_v27 = vrot.slane %v381_v7, %v2093_v39  ;;  %v557_v2 = vsel %vm556_vm7, %v509_v62, %v555_v32  ;;  %v1667_v6 = vld [vmem:[#allocation5 + $0x8] ss:$16 sps:$4 sm:$0xff]   ;;  %v1741_v32 = vld [vmem:[#allocation7 + $0x164] ss:$8 sps:$4 sm:$0xff]  }
 0x126   :  { %v291_v13 = vmul.f32 0.00390625, %v255_v9  ;;  %v252_v14 = vpop.xlane.xlu0 %251  ;;  %v1717_v9 = vld [vmem:[#allocation7 + $0xe0] ss:$8 sps:$4 sm:$0xff]   ;;  %v1730_v62 = vld [vmem:[#allocation7 + $0x130] ss:$8 sps:$4 sm:$0xff]  }
 0x127   :  { %v382_v17 = vunpack.c.l.b16 %v307_v8  ;;  %v290_v18 = vmul.f32 0.00390625, %v252_v14  ;;  %v383_v28 = vunpack.c.h.b16 %v307_v8  ;;  %v518_v48 = vsel %vm399_vm0, %v517_v27, %v513_v24  ;;  %v1672_v8 = vld [vmem:[#allocation5 + $0x2c] ss:$16 sps:$4 sm:$0xff]   ;;  %v1770_v14 = vld [vmem:[#allocation8] sm:$0xff]  }
 0x128   :  { %v1780_v24 = vld [vmem:[#allocation8 + $0x28] sm:$0xff]   ;;  %v322_v27 = vsub.s32 0, %v2087_v26 }
 0x129   :  { %v308_v29 = vpack.c.bf16 %v291_v13, %v290_v18  ;;  %v261_v30 = vpop.xlane.xlu1 %260  ;;  %v522_v31 = vrot.slane %v382_v17, %v2096_v44  ;;  %v527_v50 = vrot.slane %v383_v28, %v2099_v49  ;;  %v1769_v13 = vld [vmem:[#allocation8 + $0x40] sm:$0xff]   ;;  %v1774_v17 = vld [vmem:[#allocation8 + $0x10] sm:$0xff]   ;;  %v1775_v18 = vld [vmem:[#allocation8 + $0x58] sm:$0xff]  }
 0x12a   :  { %v293_v33 = vmul.f32 0.00390625, %v261_v30  ;;  %v258_v34 = vpop.xlane.xlu0 %257  ;;  %v2172_v28 = vld [vmem:[%s2215_s2] sm:$0xf] }
 0x12b   :  { %v384_v37 = vunpack.c.l.b16 %v308_v29  ;;  %v385_v40 = vunpack.c.h.b16 %v308_v29  ;;  %v292_v41 = vmul.f32 0.00390625, %v258_v34  ;;  %v523_v54 = vsel %vm406_vm1, %v522_v31, %v518_v48  ;;  %v1726_v48 = vld [vmem:[#allocation7 + $0x114] ss:$8 sps:$4 sm:$0xff]  }
 0x12c   :  { %v326_v29 = vsub.s32 1, %v2087_v26  ;;  %v323_v30 = vrot.slane %v2172_v28, %v322_v27 }
 0x12d   :  { %v309_v52 = vpack.c.bf16 %v293_v33, %v292_v41  ;;  %v532_v55 = vrot.slane %v384_v37, %v2090_v38  ;;  %v536_v56 = vrot.slane %v385_v40, %v2093_v39  ;;  %v528_v38 = vsel %vm413_vm2, %v527_v50, %v523_v54 }
 0x12e   :  { %v559_v4 = vsel %vm558_vm8, %v528_v38, %v557_v2  ;;  %v327_v23 = vrot.slane %v2172_v28, %v326_v29  ;;  %v334_v37 = vsub.s32 3, %v2087_v26  ;;  %v1733_v38 = vld [vmem:[#allocation7 + $0x140] ss:$8 sps:$4 sm:$0xff]   ;;  %v1742_v2 = vld [vmem:[#allocation7 + $0x170] ss:$8 sps:$4 sm:$0xff]  }
 0x12f   :  { %v386_v59 = vunpack.c.l.b16 %v309_v52  ;;  %v387_v60 = vunpack.c.h.b16 %v309_v52  ;;  %v537_v51 = vsel %vm399_vm0, %v536_v56, %v532_v55  ;;  %v1724_v55 = vld [vmem:[#allocation7 + $0x110] ss:$8 sps:$4 sm:$0xff]  }
 0x130   :  { %v335_v46 = vrot.slane %v2172_v28, %v334_v37 }
 0x131   :  { %v541_v39 = vrot.slane %v386_v59, %v2096_v44  ;;  %v546_v0 = vrot.slane %v387_v60, %v2099_v49  ;;  %v1670_v44 = vld [vmem:[#allocation5 + $0x28] ss:$16 sps:$4 sm:$0xff]   ;;  %v1715_v49 = vld [vmem:[#allocation7 + $0xe4] ss:$8 sps:$4 sm:$0xff]  }
 0x132   :  { %1121 = vmatprep.subr.bf16.mxu0 %v1715_v49  ;;  %v1727_v60 = vld [vmem:[#allocation7 + $0x120] ss:$8 sps:$4 sm:$0xff]   ;;  %v1754_v49 = vld [vmem:[#allocation7 + $0x1b0] ss:$8 sps:$4 sm:$0xff]  }
 0x133   :  { %v542_v1 = vsel %vm406_vm1, %v541_v39, %v537_v51  ;;  %1122 = vmatpush1.bf16.msra.mxu0 %v1717_v9  ;;  %v1738_v39 = vld [vmem:[#allocation7 + $0x154] ss:$8 sps:$4 sm:$0xff]   ;;  %v1739_v51 = vld [vmem:[#allocation7 + $0x160] ss:$8 sps:$4 sm:$0xff]   ;;  %v1759_v9 = vld [vmem:[#allocation7 + $0x1c4] ss:$8 sps:$4 sm:$0xff]  }
 0x134   :  { %v547_v3 = vsel %vm413_vm2, %v546_v0, %v542_v1  ;;  %1123 = vmatprep.subr.bf16.mxu0 %v1718_v10  ;;  %v1736_v0 = vld [vmem:[#allocation7 + $0x150] ss:$8 sps:$4 sm:$0xff]   ;;  %v1744_v1 = vld [vmem:[#allocation7 + $0x174] ss:$8 sps:$4 sm:$0xff]   ;;  %v1757_v10 = vld [vmem:[#allocation7 + $0x1c0] ss:$8 sps:$4 sm:$0xff]  }
 0x135   :  { %v561_v5 = vsel %vm560_vm9, %v547_v3, %v559_v4  ;;  %v1747_v3 = vld [vmem:[#allocation7 + $0x184] ss:$8 sps:$4 sm:$0xff]   ;;  %v1745_v4 = vld [vmem:[#allocation7 + $0x180] ss:$8 sps:$4 sm:$0xff]  }
 0x136   :  { %v562_v7 = vpack.c.b16 %v561_v5, %v561_v5  ;;  %v1750_v5 = vld [vmem:[#allocation7 + $0x194] ss:$8 sps:$4 sm:$0xff]  }
 0x137   :  { %1124 = vmatpush1.bf16.msra.mxu0 %v1720_v11  ;;  %v330_v11 = vsub.s32 2, %v2087_v26  ;;  %v1788_v26 = vld [vmem:[#allocation10 + $0x18] sm:$0xff]  }
 0x138   :  { %1495 = vmatmul.mubr.msk.bf16.vlgmr.msra.gmra.mrb[0].mxu1 %vm603_vm10, %v562_v7  ;;  %1134 = vmatprep.subr.bf16.mxu0 %v1723_v12  ;;  %v1762_v12 = vld [vmem:[#allocation7 + $0x1d4] ss:$8 sps:$4 sm:$0xff]  }
 0x139   :  { %649 = vmatpush1.bf16.msra.mxu1 %v1667_v6  ;;  %680 = vmatprep.mubr.bf16.mxu1 %v1944_v36  ;;  %v1773_v36 = vld [vmem:[#allocation8 + $0x50] sm:$0xff]  }
 0x13a   :  { %650 = vmatprep.subr.bf16.mxu1 %v1672_v8  ;;  %v1748_v6 = vld [vmem:[#allocation7 + $0x190] ss:$8 sps:$4 sm:$0xff]   ;;  %v1751_v8 = vld [vmem:[#allocation7 + $0x1a0] ss:$8 sps:$4 sm:$0xff]  }
 0x13d   :  { %651 = vmatpush1.bf16.msra.mxu1 %v1670_v44  ;;  %v1756_v44 = vld [vmem:[#allocation7 + $0x1b4] ss:$8 sps:$4 sm:$0xff]  }
 0x13e   :  { %1587 = vmatprep.subr.bf16.mxu1 %v1769_v13  ;;  %v1760_v13 = vld [vmem:[#allocation7 + $0x1d0] ss:$8 sps:$4 sm:$0xff]  }
 0x140   :  { %1496 = vmatmul.mubr.msk.bf16.vlgmr.msra.gmra.mrb[4].mxu1 %vm603_vm10, %v562_v7  ;;  %v1753_v7 = vld [vmem:[#allocation7 + $0x1a4] ss:$8 sps:$4 sm:$0xff]  }
 0x141   :  { %1588 = vmatpush3.bf16.msra.mxu1 %v1770_v14  ;;  %v331_v14 = vrot.slane %v2172_v28, %v330_v11  ;;  %v1784_v28 = vld [vmem:[#allocation8 + $0x38] sm:$0xff]  }
 0x142   :  { %1589 = vmatprep.subr.bf16.mxu1 %v1771_v15  ;;  %v1765_v15 = vld [vmem:[#allocation7 + $0x1e4] ss:$8 sps:$4 sm:$0xff]  }
 0x145   :  { %1590 = vmatpush3.bf16.msra.mxu1 %v1772_v16  ;;  %v1763_v16 = vld [vmem:[#allocation7 + $0x1e0] ss:$8 sps:$4 sm:$0xff]  }
 0x146   :  { %1591 = vmatprep.subr.bf16.mxu1 %v1773_v36 }
 0x149   :  { %1592 = vmatpush3.bf16.msra.mxu1 %v1774_v17  ;;  %v1768_v17 = vld [vmem:[#allocation7 + $0x1f4] ss:$8 sps:$4 sm:$0xff]  }
 0x14a   :  { %1593 = vmatprep.subr.bf16.mxu1 %v1775_v18  ;;  %v1766_v18 = vld [vmem:[#allocation7 + $0x1f0] ss:$8 sps:$4 sm:$0xff]  }
 0x14d   :  { %1594 = vmatpush3.bf16.msra.mxu1 %v1776_v19 }
 0x14e   :  { %1595 = vmatprep.subr.bf16.mxu1 %v1777_v20 }
 0x151   :  { %1596 = vmatpush3.bf16.msra.mxu1 %v1778_v21  ;;  %v1781_v21 = vld [vmem:[#allocation8 + $0x70] sm:$0xff]  }
 0x152   :  { %1597 = vmatprep.subr.bf16.mxu1 %v1779_v22  ;;  %v1782_v22 = vld [vmem:[#allocation8 + $0x30] sm:$0xff]  }
 0x155   :  { %1598 = vmatpush3.bf16.msra.mxu1 %v1780_v24  ;;  %v1783_v24 = vld [vmem:[#allocation8 + $0x78] sm:$0xff]  }
 0x156   :  { %1599 = vmatprep.subr.bf16.mxu1 %v1781_v21 }
 0x159   :  { %1600 = vmatpush3.bf16.msra.mxu1 %v1782_v22 }
 0x15a   :  { %1601 = vmatprep.subr.bf16.mxu1 %v1783_v24 }
 0x15d   :  { %1602 = vmatpush3.bf16.msra.mxu1 %v1784_v28 }
 0x20b   :  { %v641_v25 = vpop.f32.mrb[0].mxu1 }
 0x20c   :  { %v642_v31 = vadd.f32 %v641_v25, %v323_v30  ;;  %v643_v33 = vpop.f32.mrb[1].mxu1  ;;  %v1945_v30 = vmov 0.0  }
 0x20d   :  { %v644_v34 = vadd.f32 %v643_v33, %v327_v23  ;;  %v645_v35 = vpop.f32.mrb[2].mxu1  ;;  %1618 = vmatprep.subr.bf16.mxu1 %v1945_v30  ;;  %v761_v23 = vld [vmem:[%s2217_s4] sm:$0x3] }
 0x20e   :  { %v689_v40 = vmax.f32 %v642_v31, 0.0  ;;  %v646_v41 = vpop.f32.mrb[3].mxu1  ;;  %v766_v25 = vrot.slane %v761_v23, %v322_v27  ;;  %v770_v31 = vrot.slane %v761_v23, %v326_v29  ;;  %v1787_v27 = vld [vmem:[#allocation10 + $0x10] sm:$0xff]   ;;  %v1789_v29 = vld [vmem:[#allocation10 + $0x20] sm:$0xff]  }
 0x20f   :  { %v690_v42 = vmax.f32 %v644_v34, 0.0 }
 0x210   :  { %v693_v47 = vpack.c.bf16 %v689_v40, %v689_v40 }
 0x211   :  { %v694_v43 = vpack.c.bf16 %v690_v42, %v690_v42 }
 0x213   :  { %v2183_v50 = vpop.f32.mrb[4].mxu1  ;;  %1125 = vmatprep.mubr.bf16.mxu0 %v694_v43 }
 0x214   :  { %v684_v52 = vpop.f32.mrb[5].mxu1  ;;  %1126 = vmatmul.mubr.bf16.vlgmr.msra.gmra.mrb[0].mxu0 %v693_v47  ;;  %v683_v36 = vadd.f32 %v2183_v50, %v331_v14  ;;  %v1790_v50 = vld [vmem:[#allocation10 + $0x28] sm:$0xff]  }
 0x215   :  { %v685_v53 = vadd.f32 %v684_v52, %v335_v46  ;;  %1135 = vmatpush1.bf16.msra.mxu0 %v1721_v45  ;;  %v686_v54 = vpop.f32.mrb[6].mxu1  ;;  %v1785_v46 = vld [vmem:[#allocation10] sm:$0xff]   ;;  %v1791_v52 = vld [vmem:[#allocation10 + $0x30] sm:$0xff]  }
 0x216   :  { %v687_v56 = vpop.f32.mrb[7].mxu1  ;;  %1136 = vmatprep.subr.bf16.mxu0 %v1726_v48  ;;  %v691_v19 = vmax.f32 %v683_v36, 0.0  ;;  %v1786_v48 = vld [vmem:[#allocation10 + $0x8] sm:$0xff]  }
 0x217   :  { %v692_v58 = vmax.f32 %v685_v53, 0.0  ;;  %v1792_v53 = vld [vmem:[#allocation10 + $0x38] sm:$0xff]  }
 0x218   :  { %v695_v20 = vpack.c.bf16 %v691_v19, %v691_v19 }
 0x219   :  { %v696_v59 = vpack.c.bf16 %v692_v58, %v692_v58  ;;  %1137 = vmatpush1.bf16.msra.mxu0 %v1724_v55  ;;  %v1561_v55 = vld [vmem:[%s2219_s6] ss:$0 sm:$0xff] }
 0x21a   :  { %1138 = vmatprep.subr.bf16.mxu0 %v1729_v57 }
 0x21b   :  { %1166 = vmatprep.mubr.bf16.mxu0 %v696_v59 }
 0x21d   :  { %1139 = vmatpush1.bf16.msra.mxu0 %v1727_v60 }
 0x21e   :  { %1140 = vmatprep.subr.bf16.mxu0 %v1732_v61 }
 0x221   :  { %1141 = vmatpush1.bf16.msra.mxu0 %v1730_v62 }
 0x222   :  { %1142 = vmatprep.subr.bf16.mxu0 %v1735_v63  ;;  %v1578_v63 = vld [vmem:[%s2221_s8] ss:$0 sm:$0xff] }
 0x225   :  { %1143 = vmatpush1.bf16.msra.mxu0 %v1733_v38 }
 0x226   :  { %1144 = vmatprep.subr.bf16.mxu0 %v1738_v39 }
 0x229   :  { %1145 = vmatpush1.bf16.msra.mxu0 %v1736_v0 }
 0x22a   :  { %1146 = vmatprep.subr.bf16.mxu0 %v1741_v32 }
 0x22d   :  { %1147 = vmatpush1.bf16.msra.mxu0 %v1739_v51 }
 0x22e   :  { %1148 = vmatprep.subr.bf16.mxu0 %v1744_v1 }
 0x231   :  { %1149 = vmatpush1.bf16.msra.mxu0 %v1742_v2 }
 0x232   :  { %1150 = vmatprep.subr.bf16.mxu0 %v1747_v3 }
 0x235   :  { %1151 = vmatpush1.bf16.msra.mxu0 %v1745_v4 }
 0x236   :  { %1152 = vmatprep.subr.bf16.mxu0 %v1750_v5 }
 0x239   :  { %1153 = vmatpush1.bf16.msra.mxu0 %v1748_v6 }
 0x23a   :  { %1154 = vmatprep.subr.bf16.mxu0 %v1753_v7 }
 0x23d   :  { %1155 = vmatpush1.bf16.msra.mxu0 %v1751_v8 }
 0x23e   :  { %1156 = vmatprep.subr.bf16.mxu0 %v1756_v44 }
 0x241   :  { %1157 = vmatpush1.bf16.msra.mxu0 %v1754_v49 }
 0x242   :  { %1158 = vmatprep.subr.bf16.mxu0 %v1759_v9 }
 0x245   :  { %1159 = vmatpush1.bf16.msra.mxu0 %v1757_v10 }
 0x246   :  { %1160 = vmatprep.subr.bf16.mxu0 %v1762_v12 }
 0x249   :  { %1161 = vmatpush1.bf16.msra.mxu0 %v1760_v13 }
 0x24a   :  { %1162 = vmatprep.subr.bf16.mxu0 %v1765_v15 }
 0x24d   :  { %1163 = vmatpush1.bf16.msra.mxu0 %v1763_v16 }
 0x24e   :  { %1164 = vmatprep.subr.bf16.mxu0 %v1768_v17 }
 0x251   :  { %1165 = vmatpush1.bf16.msra.mxu0 %v1766_v18 }
 0x254   :  { %1167 = vmatmul.mubr.bf16.vlgmr.msra.gmra.mrb[0].mxu0 %v695_v20 }
 0x327   :  { %v1168_v33 = vpop.f32.mrb[0].mxu0 }
 0x328   :  { %v1638_v34 = vadd.f32 %v1168_v33, %v766_v25  ;;  %v1170_v35 = vpop.f32.mrb[1].mxu0 }
 0x329   :  { %v1639_v37 = vadd.f32 %v1170_v35, %v770_v31  ;;  %v1172_v40 = vpop.f32.mrb[2].mxu0 }
 0x32a   :  { %v1175_v41 = vmax.f32 %v1638_v34, 0.0  ;;  %v1173_v42 = vpop.f32.mrb[3].mxu0 }
 0x32b   :  { %v1176_v43 = vmax.f32 %v1639_v37, 0.0 }
 0x32c   :  { %v1177_v47 = vpack.c.bf16 %v1175_v41, %v1175_v41 }
 0x32d   :  { %v1178_v45 = vpack.c.bf16 %v1176_v43, %v1176_v43 }
 0x32f   :  { %1346 = vmatprep.mubr.bf16.mxu1 %v1178_v45 }
 0x330   :  { %1347 = vmatmul.mubr.bf16.vlgmr.msra.gmra.mrb[8].mxu1 %v1177_v47 }
 0x331   :  { %1619 = vmatpush3.bf16.msra.mxu1 %v1785_v46  ;;  %1634 = vmatprep.mubr.msk.bf16.mxu1 %vm1946_vm11, %v1945_v30 }
 0x332   :  { %1620 = vmatprep.subr.bf16.mxu1 %v1945_v30 }
 0x335   :  { %1621 = vmatpush3.bf16.msra.mxu1 %v1786_v48 }
 0x336   :  { %1622 = vmatprep.subr.bf16.mxu1 %v1945_v30 }
 0x339   :  { %1623 = vmatpush3.bf16.msra.mxu1 %v1787_v27 }
 0x33a   :  { %1624 = vmatprep.subr.bf16.mxu1 %v1945_v30 }
 0x33d   :  { %1625 = vmatpush3.bf16.msra.mxu1 %v1788_v26 }
 0x33e   :  { %1626 = vmatprep.subr.bf16.mxu1 %v1945_v30 }
 0x341   :  { %1627 = vmatpush3.bf16.msra.mxu1 %v1789_v29 }
 0x342   :  { %1628 = vmatprep.subr.bf16.mxu1 %v1945_v30 }
 0x345   :  { %1629 = vmatpush3.bf16.msra.mxu1 %v1790_v50 }
 0x346   :  { %1630 = vmatprep.subr.bf16.mxu1 %v1945_v30 }
 0x349   :  { %1631 = vmatpush3.bf16.msra.mxu1 %v1791_v52 }
 0x34a   :  { %1632 = vmatprep.subr.bf16.mxu1 %v1945_v30 }
 0x34d   :  { %1633 = vmatpush3.bf16.msra.mxu1 %v1792_v53 }
 0x403   :  { %v1603_v54 = vpop.f32.mrb[8].mxu1 }
 0x404   :  { %v1604_v56 = vpop.f32.mrb[9].mxu1 }
 0x405   :  { %v1605_v57 = vadd.f32 %v1604_v56, %v1603_v54  ;;  %v1606_v58 = vpop.f32.mrb[10].mxu1 }
 0x406   :  { %v1607_v59 = vpop.f32.mrb[11].mxu1 }
 0x407   :  { %v1349_v60 = vadd.f32 %v1605_v57, %v1561_v55 }
 0x409   :  { %v1354_v61 = vmax.f32 %v1349_v60, 0.0 }
 0x40b   :  { %v1355_v62 = vpack.c.bf16 %v1354_v61, %v1354_v61 }
 0x40d   :  { %1635 = vmatmul.mubr.bf16.vlgmr.msra.gmra.mrb[12].mxu1 %v1355_v62 }
 0x4e0   :  { %v1461_v38 = vpop.f32.mrb[12].mxu1 }
 0x4e1   :  { %v1462_v39 = vadd.f32 %v1578_v63, %v1461_v38  ;;  %v1636_v0 = vpop.f32.mrb[13].mxu1 }
 0x4e2   :  { %v1464_v32 = vpop.f32.mrb[14].mxu1 }
 0x4e3   :  { %1467 = vst [vmem:[#allocation11] sm:$0xff] %v1462_v39  ;;  %v1637_v51 = vpop.f32.mrb[15].mxu1 }
 0x4e4   :  { %1472 = vsyncadd [#allocation4], 96  ;;  %s1947_s6 = smov [#allocation11]  }
 0x4e5   :  { %s1473_s16 = sshll.u32 %s1947_s6, 4  ;;  %s1474_s16 = int_to_ptr.vmem [resolvable:$true] %s1473_s16 }
 0x4e6   :  { %s1903_s18 = scalar_lea.vmem %s1474_s16, 32  ;;  %s1907_s20 = scalar_lea.vmem %s1474_s16, 128 }
 0x4e7   :  { %p1904_p12 = scmp.ne.s32.totalorder %s1474_s16, %s1903_s18  ;;  %p1908_p13 = scmp.lt.s32.totalorder %s1474_s16, %s1474_s16 }
 0x4e8   :  { %p1909_p0 = scmp.lt.s32.totalorder %s1907_s20, %s1903_s18 }
 0x4ea   :  { %p1910_p1 = por %p1909_p0, %p1908_p13 }
 0x4ec   :  { %p1911_p2 = pnand %p1910_p1, %p1904_p12 }
 0x4ee   :  { %1914 = shalt.err (!%p1911_p2)
}
 0x4ef   :  { %s1915_s0 = scalar_lea.hbm %s2222_s9, 32 }
 0x4f0   :  { %p1916_p3 = scmp.ne.s32.totalorder %s2222_s9, %s1915_s0  ;;  %p1919_p4 = scmp.lt.u32.totalorder %s1915_s0, %s2222_s9 }
 0x4f2   :  { %p1921_p5 = pnand %p1919_p4, %p1916_p3 }
 0x4f4   :  { %1924 = shalt.err (!%p1921_p5)
}
 0x4f5   :  { %s1948_s25 = smov 32   ;;  %s1949_s26 = smov 2  }
 0x4f6   :  { %1479 = dma.vmem_to_hbm [thread:$0]  %s1474_s16, 32, %s2222_s9, [#allocation4], %s1948_s25, %s1948_s25, %s1949_s26  }
 0x4f7   :  { %1931 = dma.done.wait [#allocation4], 128  }
 0x4f8   :  { %1932 = vsyncadd [#allocation4], 4294967168 }
 0x4f9   :  { %1483 = vsyncpa [#allocation3], 1 }
 0x4fa   :  { %1484 = vsyncpa [#allocation6], 1 }
 0x4fb   :  { %1485 = vsyncpa [#allocation9], 1 }
 0x4fc   :  { %1486 = vsyncpa [#allocation4], 1 }

</bundles_post_ra>
